<compile_context>
chip_gen: v7x
topology: tpu7x:2x2x1
jax: 0.10.0
libtpu: 0.0.40
codegen_flags: <defaults>
</compile_context>

<pallas_src>
import warnings

import jax
import jax.numpy as jnp
import numpy as np
from jax.experimental import pallas as pl
from jax.experimental.pallas import tpu as pltpu

_LANE_CHOICES = (1024, 512, 256, 128)  # lane-dense widths (multiples of 128)
_TARGET_BLOCK_BYTES = 4 << 20          # ~4 MiB per block; x2 (in+out) x2 (double
                                       # buffer) ~= 16 MiB, within the raised
                                       # 32 MiB scoped-VMEM limit on all chips.


def _identity_forward_kernel(x_ref, o_ref):
    # Elementwise pass-through on the current lane-dense tile.
    o_ref[...] = x_ref[...]


def _dimension_semantics():
    # v7x has 2 TensorCores per chip; CORE_PARALLEL lets them each stream half
    # the rows of this DMA-bound copy.  Single-TC v5e/v6e use plain "parallel".
    try:
        kind = jax.devices()[0].device_kind.lower()
    except Exception:  # pragma: no cover - defensive
        kind = ""
    if "v7" in kind or "7x" in kind:
        return (pltpu.CORE_PARALLEL,)
    return ("parallel",)


def _identity_copy_2d(x2d, in_place):
    rows, lanes = x2d.shape
    itemsize = x2d.dtype.itemsize
    # Biggest lane-dense block within the VMEM budget.  block_rows is either a
    # multiple of 8 or equal to the full row extent, so the (8, 128) block
    # constraint holds in both cases; a partial trailing row-block is masked
    # by Pallas (safe for an identity copy).
    target_rows = max(8, (_TARGET_BLOCK_BYTES // (lanes * itemsize)) // 8 * 8)
    block_rows = rows if rows <= target_rows else target_rows
    grid = (pl.cdiv(rows, block_rows),)

    return pl.pallas_call(
        _identity_forward_kernel,
        out_shape=jax.ShapeDtypeStruct((rows, lanes), x2d.dtype),
        grid=grid,
        in_specs=[pl.BlockSpec((block_rows, lanes), lambda i: (i, 0))],
        out_specs=pl.BlockSpec((block_rows, lanes), lambda i: (i, 0)),
        # Only alias when the caller donates its buffer; otherwise XLA would
        # insert a defensive copy (an extra HBM pass) to preserve the input.
        input_output_aliases=({0: 0} if in_place else {}),
        cost_estimate=pl.CostEstimate(
            flops=0,
            transcendentals=0,
            bytes_accessed=2 * rows * lanes * itemsize,
        ),
        compiler_params=pltpu.CompilerParams(
            dimension_semantics=_dimension_semantics(),
            vmem_limit_bytes=32 << 20,
        ),
    )(x2d)


def neural_network_forward(x: jax.Array, *, in_place: bool = False) -> jax.Array:
    """Concrete realization of NeuralNetwork.forward (identity) via Pallas.

    Set ``in_place=True`` only when the caller donates ``x`` (e.g. via
    ``jax.jit(neural_network_forward, donate_argnums=0)``); the kernel output
    then aliases the caller's buffer instead of allocating a fresh HBM array.
    """
    orig_shape = x.shape
    total = x.size
    if total == 0:
        return x

    # Fast path: widest lane count that divides the flat size -> no padding,
    # no slicing, no extra HBM passes; stores are fully unmasked.
    for lanes in _LANE_CHOICES:
        if total % lanes == 0:
            out2d = _identity_copy_2d(x.reshape(total // lanes, lanes), in_place)
            return out2d.reshape(orig_shape)

    # Rare fallback (flat size not a multiple of 128): run the 1024-aligned
    # bulk through the kernel and stitch the <1024-element tail back on in the
    # wrapper — still cheaper than full-array pad + slice round trips.
    x_flat = x.reshape(total)
    lanes = _LANE_CHOICES[0]
    bulk = (total // lanes) * lanes
    if bulk == 0:
        # TODO(synk): tiny (<1024 elements) non-aligned arrays: identity
        # pass-through, nothing worth tiling onto the TPU vector units.
        return x
    out_bulk = _identity_copy_2d(x_flat[:bulk].reshape(bulk // lanes, lanes), False)
    return jnp.concatenate([out_bulk.reshape(bulk), x_flat[bulk:]]).reshape(orig_shape)


if __name__ == "__main__":
    key = jax.random.PRNGKey(0)
    # NCHW input, small shapes: batch=2, channels=4, spatial=16x16.
    x_host = np.asarray(jax.random.normal(key, (2, 4, 16, 16), dtype=jnp.float32))
    x = jnp.asarray(x_host)

    # Donate x so the in-place alias can bind the kernel output to the
    # caller's buffer (no extra HBM output allocation).  At this tiny demo
    # shape XLA may relayout around the flattening reshape and skip the
    # donation; that only emits a harmless "donated buffer not usable"
    # warning, which we silence to keep the run output clean.  At realistic
    # 128-aligned shapes the donation binds and the copy is truly in place.
    fwd = jax.jit(neural_network_forward, donate_argnums=0,
                  static_argnames=("in_place",))
    with warnings.catch_warnings():
        warnings.simplefilter("ignore")
        y = jax.block_until_ready(fwd(x, in_place=True))

    # Forward of the (abstract) base class carries identity semantics here.
    assert y.shape == x_host.shape and y.dtype == jnp.float32
    assert np.allclose(np.asarray(y), x_host)

    print("KERNEL_OK")
</pallas_src>

<mosaic_0001>
module attributes {stable_mosaic.version = 11 : i64} {
  func.func @_identity_forward_kernel(%arg0: i32, %arg1: memref<2x1024xf32, #tpu.memory_space<vmem>>, %arg2: memref<2x1024xf32, #tpu.memory_space<vmem>>) attributes {dimension_semantics = [#tpu.dimension_semantics<parallel>], iteration_bounds = array<i64: 1>, scalar_prefetch = 0 : i64, scratch_operands = 0 : i64, tpu.core_type = #tpu.core_type<tc>, window_params = [{transform_indices = @transform_0, window_bounds = array<i64: 2, 1024>}, {transform_indices = @transform_1, window_bounds = array<i64: 2, 1024>}]} {
    %c0 = arith.constant 0 : index
    %c0_0 = arith.constant 0 : index
    %0 = vector.load %arg1[%c0, %c0_0] : memref<2x1024xf32, #tpu.memory_space<vmem>>, vector<2x1024xf32>
    %c0_1 = arith.constant 0 : index
    %c0_2 = arith.constant 0 : index
    %1 = vector.load %arg2[%c0_1, %c0_2] : memref<2x1024xf32, #tpu.memory_space<vmem>>, vector<2x1024xf32>
    tpu.vector_store %arg2[%c0_1, %c0_2], %0 {strides = array<i32>} : memref<2x1024xf32, #tpu.memory_space<vmem>>, vector<2x1024xf32>,
    return
  }
  func.func @transform_0(%arg0: i32) -> (i32, i32) {
    %c0_i32 = arith.constant 0 : i32
    %c0_i32_0 = arith.constant 0 : i32
    return %arg0, %c0_i32 : i32, i32
  }
  func.func @transform_1(%arg0: i32) -> (i32, i32) {
    %c0_i32 = arith.constant 0 : i32
    %c0_i32_0 = arith.constant 0 : i32
    return %arg0, %c0_i32 : i32, i32
  }
}

</mosaic_0001>

<bundles_post_ra>
// kernel: neural_network_forward.1
= control target key start
LH: loop header
LB: loop body
LE: loop exit
PB: predicated region body
PF: predicated region fallthrough
CT: control target
= control target key end

     0   :  { %s38_s0 = inlined_call_operand.vmem [shape: f32[2,1024], index: 0, kind: input, shape index: {}, may-alias: {0,1}]   ;;  %s39_s1 = inlined_call_operand.vmem [shape: f32[2,1024], index: 1, kind: output, shape index: {}, may-alias: {0,1}]  }
   0x1   :  { %v8_v0 = vld [vmem:[%s38_s0] sm:$0xff]  ;;  %v9_v1 = vld [vmem:[%s38_s0 + $0x8] sm:$0xff] }
   0x2   :  { %10 = vst [vmem:[%s39_s1] sm:$0xff] %v8_v0  ;;  %11 = vst [vmem:[%s39_s1 + $0x8] sm:$0xff] %v9_v1 }

</bundles_post_ra>
